<compile_context>
chip_gen: v6e
topology: v6e:2x2x1
jax: 0.10.0
libtpu: 0.0.40
codegen_flags: <defaults>
</compile_context>

<pallas_src>
import functools

import jax
import jax.numpy as jnp
from jax.experimental import pallas as pl
from jax.experimental.pallas import tpu as pltpu


BATCH_ALIGN = 16  # covers bf16 sublane packing (2x8); also fine for f32


def _round_up(x, m):
    return (x + m - 1) // m * m


def actor_critic_kernel(x_ref, w1_ref, b1_ref, wh_ref, bh_ref,
                        policy_ref, value_ref, *, output_size):
    # fc1 + ReLU: bf16 (or f32) MXU operands, f32 accumulation, f32 epilogue
    # (v5e-safe — its VPU/EUP have no bf16).
    h = jnp.dot(x_ref[...], w1_ref[...], preferred_element_type=jnp.float32)
    h = jnp.maximum(h + b1_ref[...], 0.0)

    # Fused (policy | value) head: one MXU pass into a lane-dense slab.
    # Columns [0, output_size) = policy logits, column output_size = value,
    # remaining columns are zero padding (zero weights / zero bias).
    logits = jnp.dot(h.astype(wh_ref.dtype), wh_ref[...],
                     preferred_element_type=jnp.float32) + bh_ref[...]

    col = jax.lax.broadcasted_iota(jnp.int32, logits.shape, dimension=1)
    is_policy = col < output_size

    # Numerically-stable softmax restricted to the policy lanes (padded lanes
    # masked to -inf so they do not pollute the max/denominator).
    masked = jnp.where(is_policy, logits, -jnp.inf)
    m = jnp.max(masked, axis=-1, keepdims=True)
    e = jnp.where(is_policy, jnp.exp(masked - m), 0.0)
    denom = jnp.sum(e, axis=-1, keepdims=True)
    policy = e / denom                     # exact normalization (sum == 1)

    # Lane-dense, unmasked store (padded lanes hold zeros, sliced off outside).
    policy_ref[...] = policy.astype(policy_ref.dtype)

    # Value = column `output_size` of the fused logits; lane-select via a
    # masked XLU reduction, stored as a tiny f32 (tb, 1) column.
    value = jnp.sum(jnp.where(col == output_size, logits, 0.0),
                    axis=-1, keepdims=True)
    value_ref[...] = value.astype(value_ref.dtype)


def prepare_params(params, *, compute_dtype=jnp.bfloat16):
    """One-time padding / casting of the weights (do NOT call per step).

    Returns a dict of TPU-ready slabs:
      w1: (input_size, h_pad)  compute_dtype   (fc1 weight, unpadded sublane dim)
      b1: (1, h_pad)           f32
      wh: (h_pad, pc)          compute_dtype   (policy | value fused head)
      bh: (1, pc)              f32
    Zero padding on hidden/policy lanes contributes exactly 0, so results on
    the real lanes are unchanged.
    """
    input_size, hidden_size = params["w1"].shape
    output_size = params["wp"].shape[1]
    assert output_size >= 1, "output_size must be >= 1 (softmax mask assumes it)"

    h_pad = _round_up(hidden_size, 128)
    pc = _round_up(output_size + 1, 128)     # policy lanes + 1 value lane
    f32 = jnp.float32

    w1_p = (jnp.zeros((input_size, h_pad), f32)
            .at[:, :hidden_size].set(params["w1"].astype(f32)))
    b1_p = jnp.zeros((1, h_pad), f32).at[:, :hidden_size].set(params["b1"])
    wh_p = (jnp.zeros((h_pad, pc), f32)
            .at[:hidden_size, :output_size].set(params["wp"].astype(f32))
            .at[:hidden_size, output_size].set(params["wv"][:, 0].astype(f32)))
    bh_p = (jnp.zeros((1, pc), f32)
            .at[:, :output_size].set(params["bp"])
            .at[:, output_size].set(params["bv"][:, 0]))

    return {
        "w1": w1_p.astype(compute_dtype),
        "b1": b1_p,
        "wh": wh_p.astype(compute_dtype),
        "bh": bh_p,
        "input_size": input_size,
        "hidden_size": hidden_size,
        "output_size": output_size,
        "compute_dtype": compute_dtype,
    }


def actor_critic_forward(x, prepared, *, batch_tile=None):
    """x: (B, input_size). prepared: output of prepare_params()."""
    B, input_size = x.shape
    assert input_size == prepared["input_size"]
    output_size = prepared["output_size"]
    compute_dtype = prepared["compute_dtype"]
    h_pad = prepared["w1"].shape[1]
    pc = prepared["wh"].shape[1]

    if batch_tile is None:
        # >= 2 grid tiles whenever B allows it (v7x dual-TC sharding of the
        # "parallel" batch axis), capped at 1024: per-step overhead is well
        # amortized and the VMEM footprint stays at a few MiB on all
        # generations (no explicit vmem_limit_bytes needed below tb ~ 2048).
        target = pl.cdiv(B, 2) if B > BATCH_ALIGN else B
        batch_tile = max(BATCH_ALIGN, min(1024, _round_up(target, BATCH_ALIGN)))
    tb = _round_up(batch_tile, BATCH_ALIGN)
    b_pad = _round_up(B, tb)
    num_tiles = b_pad // tb

    # Only the batch axis is padded; the feature axis stays unpadded (the
    # BlockSpec's last dim equals the full array dim, which is always legal).
    x_c = x.astype(compute_dtype)
    if b_pad != B:
        x_c = jnp.pad(x_c, ((0, b_pad - B), (0, 0)))

    kernel = functools.partial(actor_critic_kernel, output_size=output_size)

    policy_slab, value_col = pl.pallas_call(
        kernel,
        out_shape=(
            jax.ShapeDtypeStruct((b_pad, pc), compute_dtype),   # policy slab
            jax.ShapeDtypeStruct((b_pad, 1), jnp.float32),      # value column
        ),
        grid=(num_tiles,),
        in_specs=[
            pl.BlockSpec((tb, input_size), lambda i: (i, 0)),   # x: batch-tiled
            pl.BlockSpec((input_size, h_pad), lambda i: (0, 0)),  # resident
            pl.BlockSpec((1, h_pad), lambda i: (0, 0)),
            pl.BlockSpec((h_pad, pc), lambda i: (0, 0)),
            pl.BlockSpec((1, pc), lambda i: (0, 0)),
        ],
        out_specs=[
            pl.BlockSpec((tb, pc), lambda i: (i, 0)),
            pl.BlockSpec((tb, 1), lambda i: (i, 0)),
        ],
        compiler_params=pltpu.CompilerParams(
            dimension_semantics=("parallel",)),
    )(x_c, prepared["w1"], prepared["b1"], prepared["wh"], prepared["bh"])

    policy = policy_slab[:B, :output_size].astype(jnp.float32)
    value = value_col[:B]
    return policy, value


def init_params(key, input_size, hidden_size, output_size):
    """Deterministic init mirroring nn.Linear shapes (stored transposed: (in, out))."""
    k1, k2, k3, k4, k5, k6 = jax.random.split(key, 6)

    def uniform(k, shape, fan_in):
        bound = 1.0 / jnp.sqrt(fan_in)
        return jax.random.uniform(k, shape, jnp.float32, -bound, bound)

    return {
        "w1": uniform(k1, (input_size, hidden_size), input_size),
        "b1": uniform(k2, (1, hidden_size), input_size),
        "wp": uniform(k3, (hidden_size, output_size), hidden_size),
        "bp": uniform(k4, (1, output_size), hidden_size),
        "wv": uniform(k5, (hidden_size, 1), hidden_size),
        "bv": uniform(k6, (1, 1), hidden_size),
    }


def reference_forward(x, params):
    """Pure-JAX f32 reference matching the PyTorch module semantics."""
    hp = jax.lax.Precision.HIGHEST
    h = jnp.maximum(jnp.dot(x, params["w1"], precision=hp) + params["b1"], 0.0)
    policy = jax.nn.softmax(jnp.dot(h, params["wp"], precision=hp)
                            + params["bp"], axis=-1)
    value = jnp.dot(h, params["wv"], precision=hp) + params["bv"]
    return policy, value


def reference_forward_quantized(x, params, compute_dtype=jnp.bfloat16):
    """Reference with the same bf16 MXU-operand quantization as the kernel."""
    c, f32 = compute_dtype, jnp.float32
    h = jnp.dot(x.astype(c), params["w1"].astype(c),
                preferred_element_type=f32) + params["b1"]
    h = jnp.maximum(h, 0.0)
    hc = h.astype(c)
    logits = jnp.dot(hc, params["wp"].astype(c),
                     preferred_element_type=f32) + params["bp"]
    value = jnp.dot(hc, params["wv"].astype(c),
                    preferred_element_type=f32) + params["bv"]
    return jax.nn.softmax(logits, axis=-1), value


if __name__ == "__main__":
    key = jax.random.PRNGKey(0)
    k_x, k_p = jax.random.split(key)

    batch, input_size, hidden_size, output_size = 36, 16, 32, 8

    x = jax.random.normal(k_x, (batch, input_size), jnp.float32)
    params = init_params(k_p, input_size, hidden_size, output_size)

    ref_policy, ref_value = reference_forward(x, params)
    refq_policy, refq_value = reference_forward_quantized(x, params)

    # --- default bf16-MXU-operand path (production) -------------------------
    prepared = prepare_params(params)            # one-time padding / casting
    policy, value = actor_critic_forward(x, prepared)
    jax.block_until_ready((policy, value))

    assert policy.shape == (batch, output_size)
    assert value.shape == (batch, 1)
    # vs quantization-matched reference: only bf16 storage rounding remains.
    assert jnp.allclose(policy, refq_policy, atol=3e-3, rtol=0)
    assert jnp.allclose(value, refq_value, atol=5e-5, rtol=1e-4)
    # vs full-f32 reference: bounded by bf16 MXU-operand quantization.
    assert jnp.allclose(policy, ref_policy, atol=2e-2, rtol=0)
    assert jnp.allclose(value, ref_value, atol=2e-2, rtol=0)
    assert jnp.allclose(jnp.sum(policy, axis=-1), 1.0, atol=5e-3)

    # --- f32 exact-parity path (same kernel, compute_dtype override) --------
    prepared32 = prepare_params(params, compute_dtype=jnp.float32)
    policy32, value32 = actor_critic_forward(x, prepared32)
    jax.block_until_ready((policy32, value32))

    assert jnp.allclose(policy32, ref_policy, atol=1e-3, rtol=1e-3)
    assert jnp.allclose(value32, ref_value, atol=1e-3, rtol=1e-3)
    assert jnp.allclose(jnp.sum(policy32, axis=-1), 1.0, atol=1e-5)

    print("KERNEL_OK")
</pallas_src>

<mosaic_0001>
module attributes {stable_mosaic.version = 11 : i64} {
  func.func @actor_critic_kernel(%arg0: i32, %arg1: memref<32x16xbf16, #tpu.memory_space<vmem>>, %arg2: memref<16x128xbf16, #tpu.memory_space<vmem>>, %arg3: memref<1x128xf32, #tpu.memory_space<vmem>>, %arg4: memref<128x128xbf16, #tpu.memory_space<vmem>>, %arg5: memref<1x128xf32, #tpu.memory_space<vmem>>, %arg6: memref<32x128xbf16, #tpu.memory_space<vmem>>, %arg7: memref<32x1xf32, #tpu.memory_space<vmem>>) attributes {dimension_semantics = [#tpu.dimension_semantics<parallel>], iteration_bounds = array<i64: 2>, scalar_prefetch = 0 : i64, scratch_operands = 0 : i64, tpu.core_type = #tpu.core_type<tc>, window_params = [{transform_indices = @transform_0, window_bounds = array<i64: 32, 16>}, {pipeline_mode = #tpu.pipeline_mode<synchronous>, transform_indices = @transform_1, window_bounds = array<i64: 16, 128>}, {pipeline_mode = #tpu.pipeline_mode<synchronous>, transform_indices = @transform_2, window_bounds = array<i64: 1, 128>}, {pipeline_mode = #tpu.pipeline_mode<synchronous>, transform_indices = @transform_3, window_bounds = array<i64: 128, 128>}, {pipeline_mode = #tpu.pipeline_mode<synchronous>, transform_indices = @transform_4, window_bounds = array<i64: 1, 128>}, {transform_indices = @transform_5, window_bounds = array<i64: 32, 128>}, {transform_indices = @transform_6, window_bounds = array<i64: 32, 1>}]} {
    %c0 = arith.constant 0 : index
    %c0_0 = arith.constant 0 : index
    %0 = vector.load %arg1[%c0, %c0_0] : memref<32x16xbf16, #tpu.memory_space<vmem>>, vector<32x16xbf16>
    %c0_1 = arith.constant 0 : index
    %c0_2 = arith.constant 0 : index
    %1 = vector.load %arg2[%c0_1, %c0_2] : memref<16x128xbf16, #tpu.memory_space<vmem>>, vector<16x128xbf16>
    %cst = arith.constant dense<0.000000e+00> : vector<32x128xf32>
    %2 = tpu.matmul %0, %1, %cst {dimension_numbers = #tpu.dot_dimension_numbers<[1], [0], [0], [1], [0, 0, 1, 1], [], []>} : vector<32x16xbf16>, vector<16x128xbf16>, vector<32x128xf32> -> vector<32x128xf32>
    %c0_3 = arith.constant 0 : index
    %c0_4 = arith.constant 0 : index
    %3 = vector.load %arg3[%c0_3, %c0_4] : memref<1x128xf32, #tpu.memory_space<vmem>>, vector<1x128xf32>
    %4 = vector.broadcast %3 : vector<1x128xf32> to vector<32x128xf32>
    %5 = arith.addf %2, %4 : vector<32x128xf32>
    %cst_5 = arith.constant 0.000000e+00 : f32
    %6 = vector.broadcast %cst_5 : f32 to vector<32x128xf32>
    %7 = arith.maximumf %5, %6 : vector<32x128xf32>
    %8 = arith.truncf %7 : vector<32x128xf32> to vector<32x128xbf16>
    %c0_6 = arith.constant 0 : index
    %c0_7 = arith.constant 0 : index
    %9 = vector.load %arg4[%c0_6, %c0_7] : memref<128x128xbf16, #tpu.memory_space<vmem>>, vector<128x128xbf16>
    %cst_8 = arith.constant dense<0.000000e+00> : vector<32x128xf32>
    %10 = tpu.matmul %8, %9, %cst_8 {dimension_numbers = #tpu.dot_dimension_numbers<[1], [0], [0], [1], [0, 0, 1, 1], [], []>} : vector<32x128xbf16>, vector<128x128xbf16>, vector<32x128xf32> -> vector<32x128xf32>
    %c0_9 = arith.constant 0 : index
    %c0_10 = arith.constant 0 : index
    %11 = vector.load %arg5[%c0_9, %c0_10] : memref<1x128xf32, #tpu.memory_space<vmem>>, vector<1x128xf32>
    %12 = vector.broadcast %11 : vector<1x128xf32> to vector<32x128xf32>
    %13 = arith.addf %10, %12 : vector<32x128xf32>
    %14 = tpu.iota {dimensions = array<i32: 1>} : vector<32x128xi32>
    %c8_i32 = arith.constant 8 : i32
    %15 = vector.broadcast %c8_i32 : i32 to vector<32x128xi32>
    %16 = arith.cmpi slt, %14, %15 : vector<32x128xi32>
    %cst_11 = arith.constant 0xFF800000 : f32
    %17 = vector.broadcast %cst_11 : f32 to vector<32x128xf32>
    %18 = arith.select %16, %13, %17 : vector<32x128xi1>, vector<32x128xf32>
    %cst_12 = arith.constant dense<0xFF800000> : vector<32xf32>
    %19 = vector.multi_reduction <maximumf>, %18, %cst_12 [1] : vector<32x128xf32> to vector<32xf32>
    %20 = vector.shape_cast %19 : vector<32xf32> to vector<32x1xf32>
    %21 = vector.broadcast %20 : vector<32x1xf32> to vector<32x128xf32>
    %22 = arith.subf %18, %21 : vector<32x128xf32>
    %23 = math.exp %22 : vector<32x128xf32>
    %cst_13 = arith.constant 0.000000e+00 : f32
    %24 = vector.broadcast %cst_13 : f32 to vector<32x128xf32>
    %25 = arith.select %16, %23, %24 : vector<32x128xi1>, vector<32x128xf32>
    %cst_14 = arith.constant dense<0.000000e+00> : vector<32xf32>
    %26 = vector.multi_reduction <add>, %25, %cst_14 [1] : vector<32x128xf32> to vector<32xf32>
    %27 = vector.shape_cast %26 : vector<32xf32> to vector<32x1xf32>
    %28 = vector.broadcast %27 : vector<32x1xf32> to vector<32x128xf32>
    %29 = arith.divf %25, %28 : vector<32x128xf32>
    %30 = arith.truncf %29 : vector<32x128xf32> to vector<32x128xbf16>
    %c0_15 = arith.constant 0 : index
    %c0_16 = arith.constant 0 : index
    %31 = vector.load %arg6[%c0_15, %c0_16] : memref<32x128xbf16, #tpu.memory_space<vmem>>, vector<32x128xbf16>
    tpu.vector_store %arg6[%c0_15, %c0_16], %30 {strides = array<i32>} : memref<32x128xbf16, #tpu.memory_space<vmem>>, vector<32x128xbf16>,
    %c8_i32_17 = arith.constant 8 : i32
    %32 = vector.broadcast %c8_i32_17 : i32 to vector<32x128xi32>
    %33 = arith.cmpi eq, %14, %32 : vector<32x128xi32>
    %cst_18 = arith.constant 0.000000e+00 : f32
    %34 = vector.broadcast %cst_18 : f32 to vector<32x128xf32>
    %35 = arith.select %33, %13, %34 : vector<32x128xi1>, vector<32x128xf32>
    %cst_19 = arith.constant dense<0.000000e+00> : vector<32xf32>
    %36 = vector.multi_reduction <add>, %35, %cst_19 [1] : vector<32x128xf32> to vector<32xf32>
    %37 = vector.shape_cast %36 : vector<32xf32> to vector<32x1xf32>
    %c0_20 = arith.constant 0 : index
    %c0_21 = arith.constant 0 : index
    %38 = vector.load %arg7[%c0_20, %c0_21] : memref<32x1xf32, #tpu.memory_space<vmem>>, vector<32x1xf32>
    tpu.vector_store %arg7[%c0_20, %c0_21], %37 {strides = array<i32>} : memref<32x1xf32, #tpu.memory_space<vmem>>, vector<32x1xf32>,
    return
  }
  func.func @transform_0(%arg0: i32) -> (i32, i32) {
    %c0_i32 = arith.constant 0 : i32
    %c0_i32_0 = arith.constant 0 : i32
    return %arg0, %c0_i32 : i32, i32
  }
  func.func @transform_1(%arg0: i32) -> (i32, i32) {
    %c0_i32 = arith.constant 0 : i32
    %c0_i32_0 = arith.constant 0 : i32
    %c0_i32_1 = arith.constant 0 : i32
    return %c0_i32, %c0_i32_0 : i32, i32
  }
  func.func @transform_2(%arg0: i32) -> (i32, i32) {
    %c0_i32 = arith.constant 0 : i32
    %c0_i32_0 = arith.constant 0 : i32
    %c0_i32_1 = arith.constant 0 : i32
    return %c0_i32, %c0_i32_0 : i32, i32
  }
  func.func @transform_3(%arg0: i32) -> (i32, i32) {
    %c0_i32 = arith.constant 0 : i32
    %c0_i32_0 = arith.constant 0 : i32
    %c0_i32_1 = arith.constant 0 : i32
    return %c0_i32, %c0_i32_0 : i32, i32
  }
  func.func @transform_4(%arg0: i32) -> (i32, i32) {
    %c0_i32 = arith.constant 0 : i32
    %c0_i32_0 = arith.constant 0 : i32
    %c0_i32_1 = arith.constant 0 : i32
    return %c0_i32, %c0_i32_0 : i32, i32
  }
  func.func @transform_5(%arg0: i32) -> (i32, i32) {
    %c0_i32 = arith.constant 0 : i32
    %c0_i32_0 = arith.constant 0 : i32
    return %arg0, %c0_i32 : i32, i32
  }
  func.func @transform_6(%arg0: i32) -> (i32, i32) {
    %c0_i32 = arith.constant 0 : i32
    %c0_i32_0 = arith.constant 0 : i32
    return %arg0, %c0_i32 : i32, i32
  }
}

</mosaic_0001>

<bundles_post_ra>
// kernel: tpu_custom_call.1
= control target key start
LH: loop header
LB: loop body
LE: loop exit
PB: predicated region body
PF: predicated region fallthrough
CT: control target
= control target key end

     0   :  { %12 = vsyncpa [#allocation3], 0  ;;  %s1152_s0 = inlined_call_operand.vmem [shape: bf16[64,16], index: 0, kind: input, shape index: {}]   ;;  %s1153_s1 = inlined_call_operand.vmem [shape: bf16[16,128], index: 1, kind: input, shape index: {}]   ;;  %s1154_s2 = inlined_call_operand.vmem [shape: f32[1,128], index: 2, kind: input, shape index: {}]   ;;  %s1155_s3 = inlined_call_operand.hbm [shape: bf16[128,128], index: 3, kind: input, shape index: {}]   ;;  %s1156_s4 = inlined_call_operand.vmem [shape: f32[1,128], index: 4, kind: input, shape index: {}]   ;;  %s1157_s5 = inlined_call_operand.hbm [shape: bf16[64,128], index: 5, kind: output, shape index: {0}]   ;;  %s1158_s6 = inlined_call_operand.vmem [shape: f32[64,1], index: 6, kind: output, shape index: {1}]  }
   0x1   :  { %13 = vsyncpa [#allocation4], 0 }
   0x2   :  { %15 = vsyncpa [#allocation4 + $0x1], 0  ;;  %s1005_s21 = smov 0   ;;  %s1007_s22 = smov 0  }
   0x3   :  { %s1009_s23 = smov 0   ;;  %s1011_s24 = smov 0  }
   0x4 LB: > { %s1026_s25 = sadd.s32 4294967295, %s962_s24   ;;  %s701_s26 = sadd.s32 4294967294, %s962_s24   ;;  %s962_s24 = sphi %s1011_s24, %s1166_s24   ;;  %s958_s23 = sphi %s1009_s23, %s1165_s23   ;;  %s954_s22 = sphi %s1007_s22, %s1164_s22   ;;  %s950_s21 = sphi %s1005_s21, %s1163_s21  }
   0x5   : > { %s1030_s27 = sadd.s32 1, %s962_s24   ;;  %s138_s28 = sadd.s32 1, %s958_s23 }
   0x6   : > { %s135_s29 = ssub.s32 %s962_s24, %s1030_s27  ;;  %p148_p0 = scmp.ne.s32.totalorder %s958_s23, %s954_s22 }
   0x7   : > { %p136_p1 = scmp.eq.s32.totalorder %s135_s29, 0  ;;  %p149_p2 = scmp.eq.s32.totalorder %s1026_s25, 1 }
   0x8   : > { %p154_p3 = scmp.ne.s32.totalorder %s954_s22, %s950_s21  ;;  %p155_p4 = scmp.eq.s32.totalorder %s701_s26, 1 }
   0x9   : > { %s1041_s30 = scalar_select %p136_p1, %s958_s23, %s138_s28  }
   0xa   : > { %p1043_p5 = por %p149_p2, %p148_p0  ;;  %p1047_p6 = por %p155_p4, %p154_p3 }
   0xb   : > { %p702_p7 = scmp.ge.s32.totalorder %s962_s24, 1  ;;  %p188_p8 = scmp.lt.s32.totalorder %s962_s24, 3 }
   0xc   : > { %s1160_s8 = scalar_select %p1047_p6, 1, 0 }
   0xd   : > { %p805_p9 = scmp.eq.s32.totalorder %s1026_s25, 0  ;;  %p1054_p10 = pnand %p702_p7, %p188_p8 }
   0xe   : > { %s964_s10 = smov [#allocation2]  }
   0xf   : > { %s206_s11 = sshll.u32 %s964_s10, 4  ;;  %p797_p11 = pneg %p1054_p10  ;;  %s207_s11 = int_to_ptr.vmem [resolvable:$true] %s206_s11 }
  0x10   : > { %s883_s12 = scalar_lea.vmem %s207_s11, 1024  ;;  %p891_p3 = scmp.lt.s32.totalorder %s207_s11, %s207_s11 }
  0x11   : > { %p798_p12 = pnand %p805_p9, %p797_p11  ;;  %p884_p0 = scmp.ne.s32.totalorder %s207_s11, %s883_s12 }
  0x12   : > { %p892_p4 = scmp.lt.s32.totalorder %s883_s12, %s883_s12 }
  0x13   : > { %p874_p13 = pneg %p798_p12 }
  0x14   : > { %p893_p6 = por %p892_p4, %p891_p3 }
  0x15   : > { %p886_p1 = pnand %p884_p0, %p874_p13 }
  0x17   : > { %p887_p2 = pneg %p886_p1 }
  0x19   : > { %p894_p7 = pnand %p893_p6, %p887_p2 }
  0x1b   : > { %897 = shalt.err (!%p894_p7)
}
  0x1c   : > { %s965_s13 = smov 64   ;;  %s966_s14 = smov 4  }
  0x1d   : > { %800 = dma.hbm_to_vmem [thread:$0]  (!%p798_p12), %s1155_s3, 1024, %s207_s11, [#allocation3], %s965_s13, %s965_s13, %s966_s14  }
  0x1e   : > { %234 = sbr.rel (%p1054_p10) target bundleno = 783 (0x30f), region = 40 }
  0x23   : > { %941 = dma.done.wait (%p805_p9), [#allocation3], 1024  }
  0x24   : > { %943 = vsyncadd (%p805_p9), [#allocation3], 4294966272  ;;  %s708_s17 = sshll.u32 %s1026_s25, 2  ;;  %v845_v0 = vld [vmem:[%s1153_s1] sm:$0xff]   ;;  %vm312_vm0 = vcmask 130048   ;;  %v848_v3 = vld [vmem:[#allocation2 + $0x38] sm:$0xff]   ;;  %v494_v26 = vlaneseq }
  0x25   : > { %p270_p8 = scmp.lt.s32.totalorder %s708_s17, 7  ;;  %765 = vmatprep.subr.bf16.mxu0 %v845_v0  ;;  %v849_v4 = vld [vmem:[#allocation2 + $0x30] sm:$0xff]   ;;  %771 = vmatprep.subr.bf16.mxu1 %v848_v3  ;;  %v850_v5 = vld [vmem:[#allocation2 + $0x28] sm:$0xff]   ;;  %v851_v6 = vld [vmem:[#allocation2 + $0x20] sm:$0xff]   ;;  %vm574_vm3 = vcmask 7168   ;;  %s740_s19 = sshll.u32 %s1026_s25, 8 }
  0x26   : > { %766 = vmatpush3.bf16.msra.mxu0 %v845_v0  ;;  %772 = vmatpush3.bf16.msra.mxu1 %v848_v3  ;;  %v852_v7 = vld [vmem:[#allocation2 + $0x18] sm:$0xff]   ;;  %v853_v8 = vld [vmem:[#allocation2 + $0x10] sm:$0xff]   ;;  %v854_v9 = vld [vmem:[#allocation2 + $0x8] sm:$0xff]   ;;  %v495_v27 = vand.u32 127, %v494_v26  ;;  %s1108_s9 = scalar_lea.hbm %s1157_s5, %s740_s19  ;;  %s967_s11 = smov [#allocation5]  }
  0x27   : > { %s1168_s17 = smov (!%p270_p8, %s708_s17), 7  ;;  %773 = vmatprep.subr.bf16.mxu1 %v849_v4  ;;  %v855_v10 = vld [vmem:[#allocation2] sm:$0xff]   ;;  %s902_s12 = sshll.u32 %s967_s11, 4  ;;  %s903_s12 = int_to_ptr.vmem [resolvable:$false] %s902_s12 }
  0x28   : > { %s709_s18 = sshll.u32 %s1168_s17, 2  ;;  %v712_v13 = vld [vmem:[%s1154_s2] ss:$0 sm:$0xff]  ;;  %vm496_vm1 = vcmp.lt.s32.totalorder %v495_v27, 8  ;;  %vm561_vm2 = vcmp.eq.s32.totalorder %v495_v27, 8  ;;  %s711_s13 = sshll.u32 %s1168_s17, 3 }
  0x29   : > { %s273_s26 = scalar_lea.vmem %s1152_s0, %s709_s18  ;;  %v718_v28 = vld [vmem:[%s1156_s4] ss:$0 sm:$0xff]  ;;  %s280_s16 = scalar_lea.vmem %s1158_s6, %s711_s13 }
  0x2a   : > { %v846_v1 = vld [vmem:[%s273_s26] sm:$0xff]   ;;  %v847_v2 = vld [vmem:[%s273_s26 + $0x8] sm:$0xff]   ;;  %774 = vmatpush3.bf16.msra.mxu1 %v849_v4  ;;  %s259_s18 = sand.u32 1, %s954_s22   ;;  %s904_s13 = scalar_lea.vmem %s903_s12, 512 }
  0x2b   : > { %767 = vmatprep.mubr.msk.bf16.mxu0 %vm312_vm0, %v846_v1  ;;  %775 = vmatprep.subr.bf16.mxu1 %v850_v5  ;;  %s707_s17 = sshll.u32 %s259_s18, 4  ;;  %s1112_s10 = scalar_lea.sflag [#allocation4], %s259_s18 }
  0x2c   : > { %768 = vmatmul.mubr.msk.bf16.vlgmr.msra.gmra.mxu0 %vm312_vm0, %v847_v2  ;;  %s261_s20 = scalar_lea.vmem [#allocation5], %s707_s17 }
  0x2d   : > { %s598_s26 = sshll.u32 %s261_s20, 4  ;;  %s1110_s26 = int_to_ptr.vmem [resolvable:$true] %s598_s26 }
  0x2e   : > { %776 = vmatpush3.bf16.msra.mxu1 %v850_v5  ;;  %s898_s25 = scalar_lea.vmem %s1110_s26, 256  ;;  %p905_p11 = scmp.lt.s32.totalorder %s1110_s26, %s903_s12 }
  0x2f   : > { %777 = vmatprep.subr.bf16.mxu1 %v851_v6  ;;  %p899_p6 = scmp.ne.s32.totalorder %s1110_s26, %s898_s25  ;;  %p906_p12 = scmp.lt.s32.totalorder %s904_s13, %s898_s25 }
  0x31   : > { %p900_p9 = pnand %p899_p6, %p1043_p5  ;;  %p907_p13 = por %p906_p12, %p905_p11 }
  0x32   : > { %778 = vmatpush3.bf16.msra.mxu1 %v851_v6 }
  0x33   : > { %779 = vmatprep.subr.bf16.mxu1 %v852_v7  ;;  %p901_p10 = pneg %p900_p9 }
  0x35   : > { %p908_p0 = pnand %p907_p13, %p901_p10 }
  0x36   : > { %780 = vmatpush3.bf16.msra.mxu1 %v852_v7 }
  0x37   : > { %781 = vmatprep.subr.bf16.mxu1 %v853_v8 }
  0x3a   : > { %782 = vmatpush3.bf16.msra.mxu1 %v853_v8 }
  0x3b   : > { %783 = vmatprep.subr.bf16.mxu1 %v854_v9 }
  0x3e   : > { %784 = vmatpush3.bf16.msra.mxu1 %v854_v9 }
  0x3f   : > { %785 = vmatprep.subr.bf16.mxu1 %v855_v10 }
  0x42   : > { %786 = vmatpush3.bf16.msra.mxu1 %v855_v10 }
  0xec   : > { %v769_v11 = vpop.f32.mrf.mxu0 }
  0xed   : > { %v362_v17 = vadd.f32 %v769_v11, %v712_v13 }
  0xee   : > { %v353_v12 = vpop.f32.mrf.mxu0 }
  0xef   : > { %v354_v15 = vadd.f32 %v712_v13, %v353_v12  ;;  %v370_v23 = vmax.f32 %v362_v17, 0.0 }
  0xf0   : > { %v770_v14 = vpop.f32.mrf.mxu0 }
  0xf1   : > { %v365_v16 = vadd.f32 %v770_v14, %v712_v13  ;;  %v368_v21 = vmax.f32 %v354_v15, 0.0 }
  0xf2   : > { %v356_v18 = vpop.f32.mrf.mxu0 }
  0xf3   : > { %v357_v19 = vadd.f32 %v712_v13, %v356_v18  ;;  %v371_v20 = vmax.f32 %v365_v16, 0.0 }
  0xf5   : > { %v369_v22 = vmax.f32 %v357_v19, 0.0  ;;  %v373_v25 = vpack.c.bf16 %v371_v20, %v370_v23 }
  0xf7   : > { %v372_v24 = vpack.c.bf16 %v369_v22, %v368_v21 }
  0xf9   : > { %787 = vmatprep.mubr.bf16.mxu1 %v372_v24 }
  0xfa   : > { %788 = vmatmul.mubr.bf16.vlgmr.msra.gmra.mxu1 %v373_v25 }
 0x1ba   : > { %v789_v29 = vpop.f32.mrf.mxu1 }
 0x1bb   : > { %v488_v30 = vadd.f32 %v789_v29, %v718_v28 }
 0x1bc   : > { %v479_v31 = vpop.f32.mrf.mxu1 }
 0x1bd   : > { %v480_v32 = vadd.f32 %v718_v28, %v479_v31  ;;  %v499_v33 = vsel %vm496_vm1, %v488_v30, -inf  ;;  %v564_v34 = vsel %vm561_vm2, %v488_v30, 0.0 }
 0x1be   : > { %505 = vmax.xlane.f32.xlu1 %v499_v33  ;;  %v790_v35 = vpop.f32.mrf.mxu1 }
 0x1bf   : > { %v491_v36 = vadd.f32 %v790_v35, %v718_v28  ;;  %v497_v37 = vsel %vm496_vm1, %v480_v32, -inf  ;;  %v562_v38 = vsel %vm561_vm2, %v480_v32, 0.0 }
 0x1c0   : > { %v482_v39 = vpop.f32.mrf.mxu1  ;;  %501 = vmax.xlane.f32.xlu0 %v497_v37 }
 0x1c1   : > { %v483_v40 = vadd.f32 %v718_v28, %v482_v39  ;;  %v500_v41 = vsel %vm496_vm1, %v491_v36, -inf  ;;  %v565_v42 = vsel %vm561_vm2, %v491_v36, 0.0 }
 0x1c2   : > { %507 = vmax.xlane.f32.xlu1 %v500_v41 }
 0x1c3   : > { %v498_v43 = vsel %vm496_vm1, %v483_v40, -inf  ;;  %v563_v44 = vsel %vm561_vm2, %v483_v40, 0.0 }
 0x1c4   : > { %503 = vmax.xlane.f32.xlu0 %v498_v43 }
 0x247   : > { %v506_v45 = vpop.xlane.xlu1 %505 }
 0x248   : > { %v511_v46 = vsub.f32 %v499_v33, %v506_v45 }
 0x249   : > { %v502_v47 = vpop.xlane.xlu0 %501 }
 0x24a   : > { %v509_v48 = vsub.f32 %v497_v37, %v502_v47  ;;  %v517_v50 = vmul.f32 1.442695, %v511_v46 }
 0x24b   : > { %v508_v49 = vpop.xlane.xlu1 %507 }
 0x24c   : > { %v513_v51 = vmul.f32 1.442695, %v509_v48  ;;  %v512_v52 = vsub.f32 %v500_v41, %v508_v49 }
 0x24d   : > { %v504_v53 = vpop.xlane.xlu0 %503 }
 0x24e   : > { %856 = vpow2.f32 %v513_v51  ;;  %v510_v54 = vsub.f32 %v498_v43, %v504_v53  ;;  %v519_v55 = vmul.f32 1.442695, %v512_v52 }
 0x24f   : > { %858 = vpow2.f32 %v517_v50 }
 0x250   : > { %v515_v56 = vmul.f32 1.442695, %v510_v54 }
 0x252   : > { %860 = vpow2.f32 %v515_v56 }
 0x253   : > { %862 = vpow2.f32 %v519_v55 }
 0x25b   : > { %v857_v57 = vpop.eup %856 }
 0x25c   : > { %v521_v58 = vsel %vm496_vm1, %v857_v57, 0.0  ;;  %v859_v59 = vpop.eup %858 }
 0x25d   : > { %525 = vadd.xlane.f32.xlu0 %v521_v58  ;;  %v523_v61 = vsel %vm496_vm1, %v859_v59, 0.0 }
 0x25f   : > { %v861_v60 = vpop.eup %860 }
 0x260   : > { %v522_v62 = vsel %vm496_vm1, %v861_v60, 0.0  ;;  %v863_v63 = vpop.eup %862 }
 0x261   : > { %529 = vadd.xlane.f32.xlu0 %v523_v61  ;;  %527 = vadd.xlane.f32.xlu1 %v522_v62  ;;  %v524_v0 = vsel %vm496_vm1, %v863_v63, 0.0 }
 0x265   : > { %566 = vadd.xlane.f32.xlu0 %v562_v38  ;;  %531 = vadd.xlane.f32.xlu1 %v524_v0 }
 0x269   : > { %570 = vadd.xlane.f32.xlu0 %v564_v34  ;;  %568 = vadd.xlane.f32.xlu1 %v563_v44 }
 0x26d   : > { %572 = vadd.xlane.f32.xlu1 %v565_v42 }
 0x2e6   : > { %v526_v1 = vpop.xlane.xlu0 %525 }
 0x2e7   : > { %864 = vrcp.f32 %v526_v1 }
 0x2ea   : > { %v528_v2 = vpop.xlane.xlu1 %527  ;;  %v530_v3 = vpop.xlane.xlu0 %529 }
 0x2eb   : > { %866 = vrcp.f32 %v528_v2 }
 0x2ec   : > { %868 = vrcp.f32 %v530_v3 }
 0x2ee   : > { %v532_v4 = vpop.xlane.xlu1 %531  ;;  %v567_v5 = vpop.xlane.xlu0 %566 }
 0x2ef   : > { %870 = vrcp.f32 %v532_v4  ;;  %575 = vst.msk [vmem:[%s280_s16] sm:$0xff] %vm574_vm3, %v567_v5 }
 0x2f2   : > { %v569_v6 = vpop.xlane.xlu1 %568  ;;  %v571_v7 = vpop.xlane.xlu0 %570 }
 0x2f3   : > { %576 = vst.msk [vmem:[%s280_s16 + $0x8] sm:$0xff] %vm574_vm3, %v569_v6  ;;  %577 = vst.msk [vmem:[%s280_s16 + $0x10] sm:$0xff] %vm574_vm3, %v571_v7 }
 0x2f4   : > { %v865_v8 = vpop.eup %864 }
 0x2f5   : > { %v534_v11 = vmul.f32 %v865_v8, %v521_v58 }
 0x2f6   : > { %v573_v9 = vpop.xlane.xlu1 %572 }
 0x2f7   : > { %578 = vst.msk [vmem:[%s280_s16 + $0x18] sm:$0xff] %vm574_vm3, %v573_v9 }
 0x2f8   : > { %v867_v10 = vpop.eup %866 }
 0x2f9   : > { %v536_v12 = vmul.f32 %v867_v10, %v522_v62  ;;  %v869_v13 = vpop.eup %868 }
 0x2fa   : > { %v538_v16 = vmul.f32 %v869_v13, %v523_v61 }
 0x2fb   : > { %v744_v14 = vpack.c.bf16 %v536_v12, %v534_v11 }
 0x2fc   : > { %v871_v15 = vpop.eup %870 }
 0x2fd   : > { %v540_v17 = vmul.f32 %v871_v15, %v524_v0  ;;  %745 = vst [vmem:[%s261_s20] sm:$0xff] %v744_v14  }
 0x2ff   : > { %v749_v18 = vpack.c.bf16 %v540_v17, %v538_v16 }
 0x301   : > { %751 = vst [vmem:[%s261_s20 + $0x8] sm:$0xff] %v749_v18  }
 0x302   : > { %911 = shalt.err (!%p908_p0)
}
 0x303   : > { %s912_s14 = scalar_lea.hbm %s1108_s9, 256  ;;  %s916_s18 = scalar_lea.hbm %s1157_s5, 512 }
 0x304   : > { %p913_p1 = scmp.ne.s32.totalorder %s1108_s9, %s912_s14  ;;  %p917_p4 = scmp.lt.s32.totalorder %s1108_s9, %s1157_s5 }
 0x305   : > { %p918_p7 = scmp.lt.s32.totalorder %s916_s18, %s912_s14 }
 0x306   : > { %p914_p2 = pnand %p913_p1, %p1043_p5 }
 0x307   : > { %p919_p8 = por %p918_p7, %p917_p4 }
 0x308   : > { %p915_p3 = pneg %p914_p2 }
 0x30a   : > { %p920_p6 = pnand %p919_p8, %p915_p3 }
 0x30c   : > { %923 = shalt.err (!%p920_p6)
}
 0x30d   : > { %s968_s20 = smov 64   ;;  %s969_s28 = smov 4  }
 0x30e   : > { %795 = dma.vmem_to_hbm [thread:$0]  (%p1043_p5), %s1110_s26, 256, %s1108_s9, %s1112_s10, %s968_s20, %s968_s20, %s969_s28  }
 0x30f PF: > { %p807_p9 = scmp.ge.s32.totalorder %s962_s24, 2  ;;  %s617_s29 = sand.u32 1, %s950_s21  }
 0x310   : > { %p1162_p10 = scmp.ne.s32.totalorder %s1160_s8, 0  ;;  %s618_s25 = scalar_lea.sflag [#allocation4], %s617_s29 }
 0x312   : > { %p802_p11 = pnand %p807_p9, %p1162_p10 }
 0x314   : > { %p803_p12 = pneg %p802_p11 }
 0x316   : > { %945 = dma.done.wait (%p803_p12), %s618_s25, 256  }
 0x317   : > { %947 = vsyncadd (%p803_p12), %s618_s25, 4294967040  ;;  %p18_p13 = scmp.ge.s32.totalorder %s1030_s27, 4   ;;  %s1163_s21 = smov %s954_s22 }
 0x318   : > { %s1164_s22 = smov %s958_s23  ;;  %s1165_s23 = smov %s1041_s30 }
 0x319   : > { %s1166_s24 = smov %s1030_s27  ;;  %20 = sbr.rel (!%p18_p13) target bundleno = 4 (0x4), region = 92 }
 0x31e   :  { %631 = vsyncpa [#allocation3], 1 }
 0x31f   :  { %633 = vsyncpa [#allocation3 + $0x1], 1 }
 0x320   :  { %634 = vsyncpa [#allocation4], 1 }
 0x321   :  { %636 = vsyncpa [#allocation4 + $0x1], 1 }

</bundles_post_ra>
